<compile_context>
chip_gen: v7x
topology: tpu7x:2x2x1
jax: 0.10.0
libtpu: 0.0.40
codegen_flags: <defaults>
</compile_context>

<pallas_src>
import functools
import math

import jax
import jax.numpy as jnp
from jax.experimental import pallas as pl
from jax.experimental.pallas import tpu as pltpu


def _round_up(x, m):
    return ((x + m - 1) // m) * m


def _cdiv(a, b):
    return (a + b - 1) // b


# ---------------------------------------------------------------------------
# Regularization.forward  ==  weight_decay * sum_i ||W_i||_p   (p in {1, 2})
# ---------------------------------------------------------------------------
def _reg_kernel(off_ref, nt_ref, w_ref, out_ref, acc_ref, *, p):
    """grid = (weight, row-block). off/nt are scalar-prefetched block ranges."""
    ki = pl.program_id(1)
    nk = nt_ref[pl.program_id(0)]          # number of row blocks of this weight

    # Zero the per-weight (8, C) VPU accumulator at the first row block.
    @pl.when(ki == 0)
    def _():
        acc_ref[...] = jnp.zeros_like(acc_ref)

    # Real row blocks only; extra grid steps (smaller weights) skip compute and
    # revisit the same input block (no new DMA).
    @pl.when(ki < nk)
    def _():
        w = w_ref[...].astype(jnp.float32)                  # (TR, C), zero padded
        v = jnp.abs(w) if p == 1 else w * w
        tr, c = v.shape
        # Pure-VPU partial reduction: fold groups of 8 rows into (8, C).
        folded = jnp.sum(v.reshape(tr // 8, 8, c), axis=0)
        acc_ref[...] = acc_ref[...] + folded

    # Last row block of this weight: one XLU collapse + p-th root, write norm.
    @pl.when(ki == nk - 1)
    def _():
        s = jnp.sum(acc_ref[...], axis=1, keepdims=True)    # (8, 1)  lane reduce
        s = jnp.sum(s, axis=0, keepdims=True)               # (1, 1)  sublane reduce
        norm = jnp.sqrt(s) if p == 2 else s
        out_ref[...] = jnp.broadcast_to(norm, out_ref.shape)


def pack_decoder_weights(weight_list, *, target_block_bytes=4 * 1024 * 1024,
                         dtype=None):
    """Flatten every (name, W) and concatenate into one lane-dense slab.

    Each weight is padded (with zeros - exact for sums of |w|^p) only up to a
    multiple of one (TR, 128) block; native dtype is preserved so DMA bytes are
    minimal. Returns (slab, TR, C, block_offsets, block_counts, max_blocks).
    """
    mats = [jnp.asarray(w) for _, w in weight_list]
    if dtype is None:
        dtype = jnp.result_type(*[m.dtype for m in mats])
    mats = [m.astype(dtype) for m in mats]

    itemsize = jnp.dtype(dtype).itemsize
    sub = 8 * max(1, 4 // itemsize)                 # 8 rows f32, 16 bf16, 32 int8
    C = 128                                          # lane width (contiguous rows)

    flat_sizes = [int(math.prod(m.shape)) for m in mats]
    rows_cap = _round_up(max(_cdiv(n, C) for n in flat_sizes), sub)
    tr_budget = max(sub, (target_block_bytes // (C * itemsize)) // sub * sub)
    TR = int(min(tr_budget, rows_cap))              # biggest useful row tile
    blk_elems = TR * C

    chunks, offs, nts = [], [], []
    blk_off = 0
    for m, n in zip(mats, flat_sizes):
        nb = _cdiv(n, blk_elems)
        chunks.append(jnp.pad(m.reshape(-1), (0, nb * blk_elems - n)))
        offs.append(blk_off)
        nts.append(nb)
        blk_off += nb
    slab = jnp.concatenate(chunks).reshape(blk_off * TR, C)
    return (slab, TR, C,
            jnp.asarray(offs, jnp.int32), jnp.asarray(nts, jnp.int32), max(nts))


def regularization_loss(weight_list, weight_decay, p=2,
                        target_block_bytes=4 * 1024 * 1024):
    """Pallas equivalent of Regularization.regularization_loss."""
    if weight_decay < 0:
        raise ValueError("param weight_decay can not < 0")
    if p not in (1, 2):
        raise NotImplementedError("only p=1 (L1) and p=2 (L2) are supported")
    if not weight_list:
        return jnp.float32(0.0)

    slab, TR, C, offs, nts, max_k = pack_decoder_weights(
        weight_list, target_block_bytes=target_block_bytes)
    n_w = len(weight_list)

    out = pl.pallas_call(
        functools.partial(_reg_kernel, p=p),
        out_shape=jax.ShapeDtypeStruct((n_w, 8, 128), jnp.float32),
        grid_spec=pltpu.PrefetchScalarGridSpec(
            num_scalar_prefetch=2,
            grid=(n_w, max_k),
            in_specs=[pl.BlockSpec(
                (TR, C),
                # Data-dependent row-block; out-of-range ki revisits the last
                # block of this weight (no fresh DMA, compute skipped).
                lambda wi, ki, off, nt: (off[wi] + jnp.minimum(ki, nt[wi] - 1), 0))],
            out_specs=pl.BlockSpec((None, 8, 128),
                                   lambda wi, ki, off, nt: (wi, 0, 0)),
            scratch_shapes=[pltpu.VMEM((8, C), jnp.float32)]),
        compiler_params=pltpu.CompilerParams(
            dimension_semantics=("parallel", "arbitrary"),
            vmem_limit_bytes=32 * 1024 * 1024),
    )(offs, nts, slab)

    norms = out[:, 0, 0]                     # per-weight ||W_i||_p
    return jnp.float32(weight_decay) * jnp.sum(norms)


def get_weight(named_params):
    """Mirror of Regularization.get_weight: decoder weight matrices only."""
    # TODO(synk): model.named_parameters() traversal is host-side bookkeeping.
    return [(name, w) for name, w in named_params.items()
            if ("dec" in name) and ("weight" in name)]


class Regularization:
    """Thin functional mirror of the PyTorch Regularization module."""

    def __init__(self, named_params, weight_decay, p=2):
        if weight_decay < 0:
            raise ValueError("param weight_decay can not < 0")
        self.weight_decay = weight_decay
        self.p = p
        self.weight_list = get_weight(named_params)

    def __call__(self, named_params):
        self.weight_list = get_weight(named_params)
        return regularization_loss(self.weight_list, self.weight_decay, p=self.p)


# ---------------------------------------------------------------------------
# Wrapped model forward (the model whose decoder weights get regularized).
# ---------------------------------------------------------------------------
def _vae_kernel(x_ref, we1_ref, be1_ref, wh_ref, bh_ref,
                wd1_ref, bd1_ref, wd2_ref, bd2_ref, out_ref, *, pad_cols):
    cdt = we1_ref.dtype
    x = x_ref[...]
    # encoder hidden (f32 accumulation, compute_dtype operands)
    h = jnp.maximum(
        jnp.dot(x, we1_ref[...], preferred_element_type=jnp.float32) + be1_ref[...],
        0.0)
    # fused mu||logvar head -> one matmul
    muv = jnp.dot(h.astype(cdt), wh_ref[...],
                  preferred_element_type=jnp.float32) + bh_ref[...]
    # decoder consumes muv directly (wd1 zero-row-padded for the logvar half,
    # so no sub-lane slice is needed inside the kernel)
    hd = jnp.maximum(
        jnp.dot(muv.astype(cdt), wd1_ref[...],
                preferred_element_type=jnp.float32) + bd1_ref[...],
        0.0)
    logits = jnp.dot(hd.astype(cdt), wd2_ref[...],
                     preferred_element_type=jnp.float32) + bd2_ref[...]
    pred = jax.nn.sigmoid(logits)

    # Single lane-dense packed output block: [mu | logvar | pred | zero pad].
    parts = [muv, pred]
    if pad_cols:
        parts.append(jnp.zeros((muv.shape[0], pad_cols), jnp.float32))
    out_ref[...] = jnp.concatenate(parts, axis=1).astype(out_ref.dtype)


def vae_forward(x, named_params, *, batch_tile=2048, compute_dtype=jnp.bfloat16):
    """Returns ((z_mu, z_logvar), predicted). Weights use torch (out, in) layout."""
    B0, D = x.shape
    Z = named_params["enc.fc_mu.weight"].shape[0]
    H = named_params["enc.fc1.weight"].shape[0]

    we1 = named_params["enc.fc1.weight"].T.astype(compute_dtype)           # (D, H)
    be1 = named_params["enc.fc1.bias"][None, :].astype(jnp.float32)        # (1, H)
    wh = jnp.concatenate([named_params["enc.fc_mu.weight"].T,
                          named_params["enc.fc_logvar.weight"].T],
                         axis=1).astype(compute_dtype)                     # (H, 2Z)
    bh = jnp.concatenate([named_params["enc.fc_mu.bias"],
                          named_params["enc.fc_logvar.bias"]])[None, :].astype(jnp.float32)
    wd1 = jnp.concatenate([named_params["dec.fc1.weight"].T,
                           jnp.zeros((Z, H), named_params["dec.fc1.weight"].dtype)],
                          axis=0).astype(compute_dtype)                    # (2Z, H)
    bd1 = named_params["dec.fc1.bias"][None, :].astype(jnp.float32)
    wd2 = named_params["dec.fc2.weight"].T.astype(compute_dtype)           # (H, D)
    bd2 = named_params["dec.fc2.bias"][None, :].astype(jnp.float32)

    W_out = _round_up(2 * Z + D, 128)        # lane-dense packed output width
    pad_cols = W_out - (2 * Z + D)

    # Batch-tiled grid; pad the batch to a tile multiple (garbage rows sliced off).
    tb = int(min(int(batch_tile), _round_up(B0, 16)))
    tb = _round_up(tb, 16)
    B = _round_up(B0, tb)
    xin = x.astype(compute_dtype)
    if B != B0:
        xin = jnp.pad(xin, ((0, B - B0), (0, 0)))

    args = (xin, we1, be1, wh, bh, wd1, bd1, wd2, bd2)

    def resident(a):
        # Whole (small) weight/bias stays VMEM-resident across all batch tiles.
        return pl.BlockSpec(a.shape, lambda i: (0,) * a.ndim)

    in_specs = [pl.BlockSpec((tb, D), lambda i: (i, 0))] + [resident(a) for a in args[1:]]

    out = pl.pallas_call(
        functools.partial(_vae_kernel, pad_cols=pad_cols),
        out_shape=jax.ShapeDtypeStruct((B, W_out), compute_dtype),
        grid=(B // tb,),
        in_specs=in_specs,
        out_specs=pl.BlockSpec((tb, W_out), lambda i: (i, 0)),
        compiler_params=pltpu.CompilerParams(dimension_semantics=("parallel",)),
    )(*args)

    mu = out[:B0, :Z]
    lv = out[:B0, Z:2 * Z]
    pred = out[:B0, 2 * Z:2 * Z + D]
    return (mu, lv), pred


# ---------------------------------------------------------------------------
# Deterministic example model + pure-JAX references
# ---------------------------------------------------------------------------
def init_model_params(key, input_dim=64, hidden_dim=32, z_dim=16):
    """Small encoder/decoder MLP; torch nn.Linear layout (weight is (out, in))."""
    ks = jax.random.split(key, 10)

    def lin(kw, kb, fan_out, fan_in):
        w = jax.random.normal(kw, (fan_out, fan_in), jnp.float32) / jnp.sqrt(fan_in)
        b = jax.random.normal(kb, (fan_out,), jnp.float32) * 0.01
        return w, b

    p = {}
    p["enc.fc1.weight"], p["enc.fc1.bias"] = lin(ks[0], ks[1], hidden_dim, input_dim)
    p["enc.fc_mu.weight"], p["enc.fc_mu.bias"] = lin(ks[2], ks[3], z_dim, hidden_dim)
    p["enc.fc_logvar.weight"], p["enc.fc_logvar.bias"] = lin(ks[4], ks[5], z_dim, hidden_dim)
    p["dec.fc1.weight"], p["dec.fc1.bias"] = lin(ks[6], ks[7], hidden_dim, z_dim)
    p["dec.fc2.weight"], p["dec.fc2.bias"] = lin(ks[8], ks[9], input_dim, hidden_dim)
    return p


def _vae_reference(x, p):
    h = jnp.maximum(x @ p["enc.fc1.weight"].T + p["enc.fc1.bias"], 0.0)
    mu = h @ p["enc.fc_mu.weight"].T + p["enc.fc_mu.bias"]
    lv = h @ p["enc.fc_logvar.weight"].T + p["enc.fc_logvar.bias"]
    hd = jnp.maximum(mu @ p["dec.fc1.weight"].T + p["dec.fc1.bias"], 0.0)
    pred = jax.nn.sigmoid(hd @ p["dec.fc2.weight"].T + p["dec.fc2.bias"])
    return (mu, lv), pred


def _reg_reference(weight_list, weight_decay, p=2):
    total = jnp.float32(0.0)
    for _, w in weight_list:
        w = jnp.asarray(w).astype(jnp.float32)
        total = total + (jnp.sum(jnp.abs(w)) if p == 1 else jnp.sqrt(jnp.sum(w * w)))
    return jnp.float32(weight_decay) * total


if __name__ == "__main__":
    key = jax.random.PRNGKey(0)
    k_x, k_p = jax.random.split(key)

    batch, input_dim, hidden_dim, z_dim = 200, 64, 32, 16
    x = jax.random.normal(k_x, (batch, input_dim), jnp.float32)
    params = init_model_params(k_p, input_dim, hidden_dim, z_dim)

    # Wrapped model forward, f32 path (batch 200 != tile multiple -> padding path).
    (mu, lv), pred = vae_forward(x, params, batch_tile=128,
                                 compute_dtype=jnp.float32)
    jax.block_until_ready((mu, lv, pred))
    (mu_r, lv_r), pred_r = _vae_reference(x, params)
    assert jnp.allclose(mu, mu_r, atol=1e-5), "mu mismatch (f32)"
    assert jnp.allclose(lv, lv_r, atol=1e-5), "logvar mismatch (f32)"
    assert jnp.allclose(pred, pred_r, atol=1e-5), "prediction mismatch (f32)"

    # bf16 default path: halves DMA bytes; loose check against the f32 reference.
    (mu_b, lv_b), pred_b = vae_forward(x, params, batch_tile=128)
    jax.block_until_ready((mu_b, lv_b, pred_b))
    assert float(jnp.max(jnp.abs(mu_b.astype(jnp.float32) - mu_r))) < 0.25, "mu mismatch (bf16)"
    assert float(jnp.max(jnp.abs(lv_b.astype(jnp.float32) - lv_r))) < 0.25, "logvar mismatch (bf16)"
    assert float(jnp.max(jnp.abs(pred_b.astype(jnp.float32) - pred_r))) < 0.1, "pred mismatch (bf16)"

    # Regularization.forward equivalent: decoder weights only, p = 2 and p = 1.
    weight_decay = 0.01
    weight_list = get_weight(params)
    reg = Regularization(params, weight_decay, p=2)
    for p_norm in (2, 1):
        loss = regularization_loss(weight_list, weight_decay, p=p_norm)
        loss = jax.block_until_ready(loss)
        ref = _reg_reference(weight_list, weight_decay, p=p_norm)
        assert jnp.allclose(loss, ref, rtol=1e-4, atol=1e-6), (
            f"regularization loss mismatch (p={p_norm}): {loss} vs {ref}")
    # Module-style call.
    loss_mod = jax.block_until_ready(reg(params))
    assert jnp.allclose(loss_mod, _reg_reference(weight_list, weight_decay, p=2),
                        rtol=1e-4, atol=1e-6), "Regularization() call mismatch"

    # bf16 decoder weights: slab stays bf16 (half the HBM bytes), accum in f32.
    wl_bf16 = [(n, w.astype(jnp.bfloat16)) for n, w in weight_list]
    loss_bf = jax.block_until_ready(regularization_loss(wl_bf16, weight_decay, p=2))
    ref_bf = _reg_reference(wl_bf16, weight_decay, p=2)
    assert jnp.allclose(loss_bf, ref_bf, rtol=1e-4, atol=1e-6), (
        f"regularization loss mismatch (bf16): {loss_bf} vs {ref_bf}")

    print("KERNEL_OK")
</pallas_src>

<mosaic_0001>
module attributes {stable_mosaic.version = 11 : i64} {
  func.func @_vae_kernel(%arg0: i32, %arg1: memref<128x64xf32, #tpu.memory_space<vmem>>, %arg2: memref<64x32xf32, #tpu.memory_space<vmem>>, %arg3: memref<1x32xf32, #tpu.memory_space<vmem>>, %arg4: memref<32x32xf32, #tpu.memory_space<vmem>>, %arg5: memref<1x32xf32, #tpu.memory_space<vmem>>, %arg6: memref<32x32xf32, #tpu.memory_space<vmem>>, %arg7: memref<1x32xf32, #tpu.memory_space<vmem>>, %arg8: memref<32x64xf32, #tpu.memory_space<vmem>>, %arg9: memref<1x64xf32, #tpu.memory_space<vmem>>, %arg10: memref<128x128xf32, #tpu.memory_space<vmem>>) attributes {dimension_semantics = [#tpu.dimension_semantics<parallel>], iteration_bounds = array<i64: 2>, scalar_prefetch = 0 : i64, scratch_operands = 0 : i64, tpu.core_type = #tpu.core_type<tc>, window_params = [{transform_indices = @transform_0, window_bounds = array<i64: 128, 64>}, {pipeline_mode = #tpu.pipeline_mode<synchronous>, transform_indices = @transform_1, window_bounds = array<i64: 64, 32>}, {pipeline_mode = #tpu.pipeline_mode<synchronous>, transform_indices = @transform_2, window_bounds = array<i64: 1, 32>}, {pipeline_mode = #tpu.pipeline_mode<synchronous>, transform_indices = @transform_3, window_bounds = array<i64: 32, 32>}, {pipeline_mode = #tpu.pipeline_mode<synchronous>, transform_indices = @transform_4, window_bounds = array<i64: 1, 32>}, {pipeline_mode = #tpu.pipeline_mode<synchronous>, transform_indices = @transform_5, window_bounds = array<i64: 32, 32>}, {pipeline_mode = #tpu.pipeline_mode<synchronous>, transform_indices = @transform_6, window_bounds = array<i64: 1, 32>}, {pipeline_mode = #tpu.pipeline_mode<synchronous>, transform_indices = @transform_7, window_bounds = array<i64: 32, 64>}, {pipeline_mode = #tpu.pipeline_mode<synchronous>, transform_indices = @transform_8, window_bounds = array<i64: 1, 64>}, {transform_indices = @transform_9, window_bounds = array<i64: 128, 128>}]} {
    %c0 = arith.constant 0 : index
    %c0_0 = arith.constant 0 : index
    %0 = vector.load %arg1[%c0, %c0_0] : memref<128x64xf32, #tpu.memory_space<vmem>>, vector<128x64xf32>
    %c0_1 = arith.constant 0 : index
    %c0_2 = arith.constant 0 : index
    %1 = vector.load %arg2[%c0_1, %c0_2] : memref<64x32xf32, #tpu.memory_space<vmem>>, vector<64x32xf32>
    %cst = arith.constant dense<0.000000e+00> : vector<128x32xf32>
    %2 = tpu.matmul %0, %1, %cst {dimension_numbers = #tpu.dot_dimension_numbers<[1], [0], [0], [1], [0, 0, 1, 1], [], []>} : vector<128x64xf32>, vector<64x32xf32>, vector<128x32xf32> -> vector<128x32xf32>
    %c0_3 = arith.constant 0 : index
    %c0_4 = arith.constant 0 : index
    %3 = vector.load %arg3[%c0_3, %c0_4] : memref<1x32xf32, #tpu.memory_space<vmem>>, vector<1x32xf32>
    %4 = vector.broadcast %3 : vector<1x32xf32> to vector<128x32xf32>
    %5 = arith.addf %2, %4 : vector<128x32xf32>
    %cst_5 = arith.constant 0.000000e+00 : f32
    %6 = vector.broadcast %cst_5 : f32 to vector<128x32xf32>
    %7 = arith.maximumf %5, %6 : vector<128x32xf32>
    %c0_6 = arith.constant 0 : index
    %c0_7 = arith.constant 0 : index
    %8 = vector.load %arg4[%c0_6, %c0_7] : memref<32x32xf32, #tpu.memory_space<vmem>>, vector<32x32xf32>
    %cst_8 = arith.constant dense<0.000000e+00> : vector<128x32xf32>
    %9 = tpu.matmul %7, %8, %cst_8 {dimension_numbers = #tpu.dot_dimension_numbers<[1], [0], [0], [1], [0, 0, 1, 1], [], []>} : vector<128x32xf32>, vector<32x32xf32>, vector<128x32xf32> -> vector<128x32xf32>
    %c0_9 = arith.constant 0 : index
    %c0_10 = arith.constant 0 : index
    %10 = vector.load %arg5[%c0_9, %c0_10] : memref<1x32xf32, #tpu.memory_space<vmem>>, vector<1x32xf32>
    %11 = vector.broadcast %10 : vector<1x32xf32> to vector<128x32xf32>
    %12 = arith.addf %9, %11 : vector<128x32xf32>
    %c0_11 = arith.constant 0 : index
    %c0_12 = arith.constant 0 : index
    %13 = vector.load %arg6[%c0_11, %c0_12] : memref<32x32xf32, #tpu.memory_space<vmem>>, vector<32x32xf32>
    %cst_13 = arith.constant dense<0.000000e+00> : vector<128x32xf32>
    %14 = tpu.matmul %12, %13, %cst_13 {dimension_numbers = #tpu.dot_dimension_numbers<[1], [0], [0], [1], [0, 0, 1, 1], [], []>} : vector<128x32xf32>, vector<32x32xf32>, vector<128x32xf32> -> vector<128x32xf32>
    %c0_14 = arith.constant 0 : index
    %c0_15 = arith.constant 0 : index
    %15 = vector.load %arg7[%c0_14, %c0_15] : memref<1x32xf32, #tpu.memory_space<vmem>>, vector<1x32xf32>
    %16 = vector.broadcast %15 : vector<1x32xf32> to vector<128x32xf32>
    %17 = arith.addf %14, %16 : vector<128x32xf32>
    %cst_16 = arith.constant 0.000000e+00 : f32
    %18 = vector.broadcast %cst_16 : f32 to vector<128x32xf32>
    %19 = arith.maximumf %17, %18 : vector<128x32xf32>
    %c0_17 = arith.constant 0 : index
    %c0_18 = arith.constant 0 : index
    %20 = vector.load %arg8[%c0_17, %c0_18] : memref<32x64xf32, #tpu.memory_space<vmem>>, vector<32x64xf32>
    %cst_19 = arith.constant dense<0.000000e+00> : vector<128x64xf32>
    %21 = tpu.matmul %19, %20, %cst_19 {dimension_numbers = #tpu.dot_dimension_numbers<[1], [0], [0], [1], [0, 0, 1, 1], [], []>} : vector<128x32xf32>, vector<32x64xf32>, vector<128x64xf32> -> vector<128x64xf32>
    %c0_20 = arith.constant 0 : index
    %c0_21 = arith.constant 0 : index
    %22 = vector.load %arg9[%c0_20, %c0_21] : memref<1x64xf32, #tpu.memory_space<vmem>>, vector<1x64xf32>
    %23 = vector.broadcast %22 : vector<1x64xf32> to vector<128x64xf32>
    %24 = arith.addf %21, %23 : vector<128x64xf32>
    %25 = arith.negf %24 : vector<128x64xf32>
    %26 = math.exp %25 : vector<128x64xf32>
    %cst_22 = arith.constant 1.000000e+00 : f32
    %27 = vector.broadcast %cst_22 : f32 to vector<128x64xf32>
    %28 = arith.addf %27, %26 : vector<128x64xf32>
    %29 = arith.divf %27, %28 : vector<128x64xf32>
    %cst_23 = arith.constant 0.000000e+00 : f32
    %30 = vector.broadcast %cst_23 : f32 to vector<128x32xf32>
    %31 = tpu.concatenate %12, %29, %30 in 1 : vector<128x32xf32>, vector<128x64xf32>, vector<128x32xf32> -> vector<128x128xf32>
    %c0_24 = arith.constant 0 : index
    %c0_25 = arith.constant 0 : index
    %32 = vector.load %arg10[%c0_24, %c0_25] : memref<128x128xf32, #tpu.memory_space<vmem>>, vector<128x128xf32>
    tpu.vector_store %arg10[%c0_24, %c0_25], %31 {strides = array<i32>} : memref<128x128xf32, #tpu.memory_space<vmem>>, vector<128x128xf32>,
    return
  }
  func.func @transform_0(%arg0: i32) -> (i32, i32) {
    %c0_i32 = arith.constant 0 : i32
    %c0_i32_0 = arith.constant 0 : i32
    return %arg0, %c0_i32 : i32, i32
  }
  func.func @transform_1(%arg0: i32) -> (i32, i32) {
    %c0_i32 = arith.constant 0 : i32
    %c0_i32_0 = arith.constant 0 : i32
    %c0_i32_1 = arith.constant 0 : i32
    return %c0_i32, %c0_i32_0 : i32, i32
  }
  func.func @transform_2(%arg0: i32) -> (i32, i32) {
    %c0_i32 = arith.constant 0 : i32
    %c0_i32_0 = arith.constant 0 : i32
    %c0_i32_1 = arith.constant 0 : i32
    return %c0_i32, %c0_i32_0 : i32, i32
  }
  func.func @transform_3(%arg0: i32) -> (i32, i32) {
    %c0_i32 = arith.constant 0 : i32
    %c0_i32_0 = arith.constant 0 : i32
    %c0_i32_1 = arith.constant 0 : i32
    return %c0_i32, %c0_i32_0 : i32, i32
  }
  func.func @transform_4(%arg0: i32) -> (i32, i32) {
    %c0_i32 = arith.constant 0 : i32
    %c0_i32_0 = arith.constant 0 : i32
    %c0_i32_1 = arith.constant 0 : i32
    return %c0_i32, %c0_i32_0 : i32, i32
  }
  func.func @transform_5(%arg0: i32) -> (i32, i32) {
    %c0_i32 = arith.constant 0 : i32
    %c0_i32_0 = arith.constant 0 : i32
    %c0_i32_1 = arith.constant 0 : i32
    return %c0_i32, %c0_i32_0 : i32, i32
  }
  func.func @transform_6(%arg0: i32) -> (i32, i32) {
    %c0_i32 = arith.constant 0 : i32
    %c0_i32_0 = arith.constant 0 : i32
    %c0_i32_1 = arith.constant 0 : i32
    return %c0_i32, %c0_i32_0 : i32, i32
  }
  func.func @transform_7(%arg0: i32) -> (i32, i32) {
    %c0_i32 = arith.constant 0 : i32
    %c0_i32_0 = arith.constant 0 : i32
    %c0_i32_1 = arith.constant 0 : i32
    return %c0_i32, %c0_i32_0 : i32, i32
  }
  func.func @transform_8(%arg0: i32) -> (i32, i32) {
    %c0_i32 = arith.constant 0 : i32
    %c0_i32_0 = arith.constant 0 : i32
    %c0_i32_1 = arith.constant 0 : i32
    return %c0_i32, %c0_i32_0 : i32, i32
  }
  func.func @transform_9(%arg0: i32) -> (i32, i32) {
    %c0_i32 = arith.constant 0 : i32
    %c0_i32_0 = arith.constant 0 : i32
    return %arg0, %c0_i32 : i32, i32
  }
}

</mosaic_0001>

<bundles_post_ra>
// kernel: tpu_custom_call.1
= control target key start
LH: loop header
LB: loop body
LE: loop exit
PB: predicated region body
PF: predicated region fallthrough
CT: control target
= control target key end

     0   :  { %14 = vsyncpa [#allocation3], 0  ;;  %s2501_s0 = inlined_call_operand.vmem [shape: f32[256,64], index: 0, kind: input, shape index: {}]   ;;  %s2502_s1 = inlined_call_operand.vmem [shape: f32[64,32], index: 1, kind: input, shape index: {}]   ;;  %s2503_s2 = inlined_call_operand.vmem [shape: f32[1,32], index: 2, kind: input, shape index: {}]   ;;  %s2504_s3 = inlined_call_operand.vmem [shape: f32[32,32], index: 3, kind: input, shape index: {}]   ;;  %s2505_s4 = inlined_call_operand.vmem [shape: f32[1,32], index: 4, kind: input, shape index: {}]   ;;  %s2506_s5 = inlined_call_operand.vmem [shape: f32[32,32], index: 5, kind: input, shape index: {}]   ;;  %s2507_s6 = inlined_call_operand.vmem [shape: f32[1,32], index: 6, kind: input, shape index: {}]   ;;  %s2508_s7 = inlined_call_operand.vmem [shape: f32[32,64], index: 7, kind: input, shape index: {}]   ;;  %s2509_s8 = inlined_call_operand.vmem [shape: f32[1,64], index: 8, kind: input, shape index: {}]   ;;  %s2510_s9 = inlined_call_operand.hbm [shape: f32[256,128], index: 9, kind: output, shape index: {}]  }
   0x1   :  { %16 = vsyncpa [#allocation3 + $0x1], 0  ;;  %s2074_s30 = smov 0   ;;  %s2076_s10 = smov 0  }
   0x2   :  { %s2078_s11 = smov 0   ;;  %s2080_s12 = smov 0  }
   0x3 LB: > { %s2095_s13 = sadd.s32 4294967295, %s2018_s12   ;;  %s1489_s14 = sadd.s32 4294967294, %s2018_s12   ;;  %s2018_s12 = sphi %s2080_s12, %s2516_s12   ;;  %s2014_s11 = sphi %s2078_s11, %s2515_s11   ;;  %s2010_s10 = sphi %s2076_s10, %s2514_s10   ;;  %s2006_s30 = sphi %s2074_s30, %s2513_s30  }
   0x4   : > { %s2099_s15 = sadd.s32 1, %s2018_s12   ;;  %s223_s16 = sadd.s32 1, %s2014_s11 }
   0x5   : > { %s220_s17 = ssub.s32 %s2018_s12, %s2099_s15  ;;  %p233_p0 = scmp.ne.s32.totalorder %s2014_s11, %s2010_s10 }
   0x6   : > { %p221_p1 = scmp.eq.s32.totalorder %s220_s17, 0  ;;  %p234_p2 = scmp.eq.s32.totalorder %s2095_s13, 1 }
   0x7   : > { %p239_p3 = scmp.ne.s32.totalorder %s2010_s10, %s2006_s30  ;;  %p240_p4 = scmp.eq.s32.totalorder %s1489_s14, 1 }
   0x8   : > { %s2110_s18 = scalar_select %p221_p1, %s2014_s11, %s223_s16  }
   0x9   : > { %p2112_p5 = por %p234_p2, %p233_p0  ;;  %p2116_p6 = por %p240_p4, %p239_p3 }
   0xa   : > { %p1492_p7 = scmp.ge.s32.totalorder %s2018_s12, 1  ;;  %p291_p8 = scmp.lt.s32.totalorder %s2018_s12, 3 }
   0xc   : > { %p292_p9 = pnand %p1492_p7, %p291_p8 }
   0xd   : > { %v350_v0 = vld [vmem:[%s2502_s1] sm:$0xff] (!%p292_p9)  ;;  %v351_v1 = vld [vmem:[%s2502_s1 + $0x8] sm:$0xff] (!%p292_p9)  ;;  %v352_v2 = vld [vmem:[%s2502_s1 + $0x10] sm:$0xff] (!%p292_p9)  ;;  %s1494_s27 = sshll.u32 (!%p292_p9), %s2095_s13, 4  ;;  %vm365_vm0 = vcmask (!%p292_p9), 523264   ;;  %vm586_vm1 = vcmask (!%p292_p9), 261120  }
   0xe   : > { %295 = sbr.rel (%p292_p9) target bundleno = 1088 (0x440), region = 56  ;;  %v1806_v3 = vpack.c.bf16 (!%p292_p9), %v351_v1, %v350_v0  ;;  %v353_v4 = vld [vmem:[%s2502_s1 + $0x18] sm:$0xff] (!%p292_p9)  ;;  %p328_p10 = scmp.lt.s32.totalorder (!%p292_p9), %s1494_s27, 31  ;;  %v354_v6 = vld [vmem:[%s2502_s1 + $0x20] sm:$0xff] (!%p292_p9)  ;;  %v355_v7 = vld [vmem:[%s2502_s1 + $0x28] sm:$0xff] (!%p292_p9)  ;;  %vm1380_vm2 = vcmask (!%p292_p9), 785408  }
   0xf   : > { %v1810_v5 = vpack.c.bf16 (!%p292_p9), %v353_v4, %v352_v2  ;;  %v575_v8 = vld [vmem:[%s2504_s3] sm:$0xff] (!%p292_p9)  ;;  %v576_v9 = vld [vmem:[%s2504_s3 + $0x8] sm:$0xff] (!%p292_p9)  ;;  %v1814_v11 = vpack.c.bf16 (!%p292_p9), %v355_v7, %v354_v6  ;;  %v356_v12 = vld [vmem:[%s2502_s1 + $0x30] sm:$0xff] (!%p292_p9)  ;;  %s324_s28 = sand.u32 (!%p292_p9), 1, %s2010_s10   ;;  %s1585_s16 = sshll.u32 (!%p292_p9), %s2095_s13, 11 }
  0x10   : > { %1807 = vmatprep.subr.bf16.mxu0 (!%p292_p9), %v1806_v3  ;;  %v1822_v10 = vpack.c.bf16 (!%p292_p9), %v576_v9, %v575_v8  ;;  %v357_v13 = vld [vmem:[%s2502_s1 + $0x38] sm:$0xff] (!%p292_p9)  ;;  %v577_v31 = vld [vmem:[%s2504_s3 + $0x10] sm:$0xff] (!%p292_p9)  ;;  %v780_v34 = vld [vmem:[%s2506_s5] sm:$0xff] (!%p292_p9)  ;;  %s1493_s29 = sshll.u32 (!%p292_p9), %s324_s28, 7  ;;  %s2460_s13 = scalar_lea.sflag (!%p292_p9), [#allocation3], %s324_s28 }
  0x11   : > { %1809 = vmatpush3.bf16.msra.mxu0 (!%p292_p9), %v1806_v3  ;;  %v1818_v15 = vpack.c.bf16 (!%p292_p9), %v357_v13, %v356_v12  ;;  %v578_v32 = vld [vmem:[%s2504_s3 + $0x18] sm:$0xff] (!%p292_p9)  ;;  %v781_v35 = vld [vmem:[%s2506_s5 + $0x8] sm:$0xff] (!%p292_p9)  ;;  %v2205_v37 = vld [vmem:[%s2503_s2] ss:$0 sm:$0xff] (!%p292_p9)  ;;  %s2386_s14 = scalar_lea.vmem (!%p292_p9), [#allocation2], %s1493_s29  ;;  %s2021_s24 = smov (!%p292_p9), [#allocation2]  }
  0x12   : > { %1811 = vmatprep.subr.bf16.mxu0 (!%p292_p9), %v1810_v5  ;;  %1823 = vmatprep.subr.bf16.mxu1 (!%p292_p9), %v1822_v10  ;;  %v1826_v33 = vpack.c.bf16 (!%p292_p9), %v578_v32, %v577_v31  ;;  %v1830_v36 = vpack.c.bf16 (!%p292_p9), %v781_v35, %v780_v34  ;;  %v782_v42 = vld [vmem:[%s2506_s5 + $0x10] sm:$0xff] (!%p292_p9)  ;;  %v783_v43 = vld [vmem:[%s2506_s5 + $0x18] sm:$0xff] (!%p292_p9)  ;;  %v1513_v31 = vld [vmem:[%s2505_s4] ss:$0 sm:$0xff] (!%p292_p9)  ;;  %s1427_s17 = sshll.u32 (!%p292_p9), %s2386_s14, 4  ;;  %s1960_s25 = sshll.u32 (!%p292_p9), %s2021_s24, 4  ;;  %s2450_s17 = int_to_ptr.vmem [resolvable:$true] %s1427_s17  ;;  %s1961_s25 = int_to_ptr.vmem [resolvable:$false] %s1960_s25 }
  0x13   : > { %1825 = vmatpush3.bf16.msra.mxu1 (!%p292_p9), %v1822_v10  ;;  %v1834_v49 = vpack.c.bf16 (!%p292_p9), %v783_v43, %v782_v42  ;;  %s1956_s23 = scalar_lea.vmem (!%p292_p9), %s2450_s17, 2048  ;;  %p1963_p0 = scmp.lt.s32.totalorder (!%p292_p9), %s2450_s17, %s1961_s25 }
  0x14   : > { %1827 = vmatprep.subr.bf16.mxu1 (!%p292_p9), %v1826_v33  ;;  %p1957_p11 = scmp.ne.s32.totalorder (!%p292_p9), %s2450_s17, %s1956_s23 }
  0x15   : > { %s2518_s27 = smov (!%p328_p10, %s1494_s27), 31  ;;  %1813 = vmatpush3.bf16.msra.mxu0 %v1810_v5 }
  0x16   : > { %s1495_s26 = sshll.u32 %s2518_s27, 3  ;;  %1815 = vmatprep.subr.bf16.mxu0 %v1814_v11  ;;  %s2448_s27 = scalar_lea.hbm %s2510_s9, %s1585_s16 }
  0x17   : > { %s2156_s22 = scalar_lea.vmem %s2501_s0, %s1495_s26  ;;  %1829 = vmatpush3.bf16.msra.mxu1 %v1826_v33  ;;  %s2020_s26 = smov 32  }
  0x18   : > { %v334_v14 = vld [vmem:[%s2156_s22] sm:$0xff]  ;;  %v335_v16 = vld [vmem:[%s2156_s22 + $0x8] sm:$0xff]  ;;  %v336_v17 = vld [vmem:[%s2156_s22 + $0x10] sm:$0xff]  ;;  %1831 = vmatprep.subr.bf16.mxu1 %v1830_v36  ;;  %p1958_p12 = pnand %p1957_p11, %p2112_p5 }
  0x19   : > { %1686 = vmatprep.mubr.msk.f32.mxu0 %vm365_vm0, %v334_v14  ;;  %1817 = vmatpush3.bf16.msra.mxu0 %v1814_v11  ;;  %v337_v18 = vld [vmem:[%s2156_s22 + $0x18] sm:$0xff]  ;;  %v338_v19 = vld [vmem:[%s2156_s22 + $0x20] sm:$0xff]  ;;  %v339_v20 = vld [vmem:[%s2156_s22 + $0x28] sm:$0xff] }
  0x1a   : > { %1819 = vmatprep.subr.bf16.mxu0 %v1818_v15  ;;  %v340_v21 = vld [vmem:[%s2156_s22 + $0x30] sm:$0xff]  ;;  %v341_v22 = vld [vmem:[%s2156_s22 + $0x38] sm:$0xff]  ;;  %v342_v23 = vld [vmem:[%s2156_s22 + $0x40] sm:$0xff]  ;;  %p1959_p13 = pneg %p1958_p12 }
  0x1b   : > { %v343_v24 = vld [vmem:[%s2156_s22 + $0x48] sm:$0xff]  ;;  %v344_v25 = vld [vmem:[%s2156_s22 + $0x50] sm:$0xff]  ;;  %v345_v26 = vld [vmem:[%s2156_s22 + $0x58] sm:$0xff] }
  0x1c   : > { %v346_v27 = vld [vmem:[%s2156_s22 + $0x60] sm:$0xff]  ;;  %v347_v28 = vld [vmem:[%s2156_s22 + $0x68] sm:$0xff]  ;;  %v348_v29 = vld [vmem:[%s2156_s22 + $0x70] sm:$0xff] }
  0x1d   : > { %1821 = vmatpush3.bf16.msra.mxu0 %v1818_v15  ;;  %v349_v30 = vld [vmem:[%s2156_s22 + $0x78] sm:$0xff] }
  0x20   : > { %1687 = vmatmul.mubr.msk.f32.vlgmr.msra.gmra.mrb[0].mxu0 %vm365_vm0, %v335_v16 }
  0x21   : > { %1689 = vmatprep.mubr.msk.f32.mxu0 %vm365_vm0, %v336_v17 }
  0x24   : > { %1690 = vmatmul.mubr.msk.f32.gmra.mrb[2].mxu0 %vm365_vm0, %v337_v18 }
  0x25   : > { %1692 = vmatprep.mubr.msk.f32.mxu0 %vm365_vm0, %v338_v19 }
  0x28   : > { %1693 = vmatmul.mubr.msk.f32.gmra.mrb[4].mxu0 %vm365_vm0, %v339_v20 }
  0x29   : > { %1695 = vmatprep.mubr.msk.f32.mxu0 %vm365_vm0, %v340_v21 }
  0x2c   : > { %1696 = vmatmul.mubr.msk.f32.gmra.mrb[6].mxu0 %vm365_vm0, %v341_v22 }
  0x2d   : > { %1698 = vmatprep.mubr.msk.f32.mxu0 %vm365_vm0, %v342_v23 }
  0x30   : > { %1699 = vmatmul.mubr.msk.f32.gmra.mrb[8].mxu0 %vm365_vm0, %v343_v24 }
  0x31   : > { %1701 = vmatprep.mubr.msk.f32.mxu0 %vm365_vm0, %v344_v25  ;;  %v1000_v25 = vld [vmem:[%s2508_s7] sm:$0xff] }
  0x34   : > { %1702 = vmatmul.mubr.msk.f32.gmra.mrb[10].mxu0 %vm365_vm0, %v345_v26  ;;  %v1001_v26 = vld [vmem:[%s2508_s7 + $0x8] sm:$0xff] }
  0x35   : > { %1704 = vmatprep.mubr.msk.f32.mxu0 %vm365_vm0, %v346_v27  ;;  %v1002_v27 = vld [vmem:[%s2508_s7 + $0x10] sm:$0xff] }
  0x38   : > { %1705 = vmatmul.mubr.msk.f32.gmra.mrb[12].mxu0 %vm365_vm0, %v347_v28  ;;  %v1838_v28 = vpack.c.bf16 %v1001_v26, %v1000_v25 }
  0x39   : > { %1707 = vmatprep.mubr.msk.f32.mxu0 %vm365_vm0, %v348_v29  ;;  %v1003_v29 = vld [vmem:[%s2508_s7 + $0x18] sm:$0xff] }
  0x3a   : > { %1839 = vmatprep.subr.bf16.mxu0 %v1838_v28 }
  0x3b   : > { %1841 = vmatpush3.bf16.msra.mxu0 %v1838_v28 }
  0x3c   : > { %1708 = vmatmul.mubr.msk.f32.gmra.mrb[14].mxu0 %vm365_vm0, %v349_v30  ;;  %v1842_v30 = vpack.c.bf16 %v1003_v29, %v1002_v27 }
  0x3e   : > { %1843 = vmatprep.subr.bf16.mxu0 %v1842_v30 }
  0x3f   : > { %1845 = vmatpush3.bf16.msra.mxu0 %v1842_v30 }
  0xf3   : > { %v1688_v38 = vpop.f32.mrb[0].mxu0 }
  0xf4   : > { %v486_v39 = vadd.f32 %v1688_v38, %v2205_v37  ;;  %v480_v40 = vpop.f32.mrb[1].mxu0 }
  0xf5   : > { %v481_v41 = vadd.f32 %v2205_v37, %v480_v40 }
  0xf6   : > { %v560_v46 = vmax.f32 %v486_v39, 0.0 }
  0xf7   : > { %v559_v44 = vmax.f32 %v481_v41, 0.0  ;;  %v1691_v45 = vpop.f32.mrb[2].mxu0 }
  0xf8   : > { %v496_v47 = vadd.f32 %v1691_v45, %v2205_v37  ;;  %v490_v48 = vpop.f32.mrb[3].mxu0 }
  0xf9   : > { %v491_v50 = vadd.f32 %v2205_v37, %v490_v48  ;;  %1718 = vmatprep.mubr.msk.f32.mxu1 %vm586_vm1, %v559_v44 }
  0xfa   : > { %1719 = vmatmul.mubr.msk.f32.vlgmr.msra.gmra.mrb[0].mxu1 %vm586_vm1, %v560_v46  ;;  %v562_v53 = vmax.f32 %v496_v47, 0.0 }
  0xfb   : > { %v561_v51 = vmax.f32 %v491_v50, 0.0  ;;  %v1694_v52 = vpop.f32.mrb[4].mxu0  ;;  %1833 = vmatpush3.bf16.msra.mxu1 %v1830_v36 }
  0xfc   : > { %v506_v54 = vadd.f32 %v1694_v52, %v2205_v37  ;;  %v500_v55 = vpop.f32.mrb[5].mxu0  ;;  %1835 = vmatprep.subr.bf16.mxu1 %v1834_v49 }
  0xfd   : > { %v501_v56 = vadd.f32 %v2205_v37, %v500_v55  ;;  %1721 = vmatprep.mubr.msk.f32.mxu1 %vm586_vm1, %v561_v51 }
  0xfe   : > { %v564_v57 = vmax.f32 %v506_v54, 0.0  ;;  %1722 = vmatmul.mubr.msk.f32.gmra.mrb[2].mxu1 %vm586_vm1, %v562_v53 }
  0xff   : > { %v563_v58 = vmax.f32 %v501_v56, 0.0  ;;  %v1697_v59 = vpop.f32.mrb[6].mxu0  ;;  %1837 = vmatpush3.bf16.msra.mxu1 %v1834_v49 }
 0x100   : > { %v516_v60 = vadd.f32 %v1697_v59, %v2205_v37  ;;  %v510_v61 = vpop.f32.mrb[7].mxu0  ;;  %1846 = vmatprep.subr.bf16.mxu1 %v1838_v28 }
 0x101   : > { %v511_v62 = vadd.f32 %v2205_v37, %v510_v61  ;;  %1724 = vmatprep.mubr.msk.f32.mxu1 %vm586_vm1, %v563_v58 }
 0x102   : > { %v566_v63 = vmax.f32 %v516_v60, 0.0  ;;  %1725 = vmatmul.mubr.msk.f32.gmra.mrb[4].mxu1 %vm586_vm1, %v564_v57 }
 0x103   : > { %v565_v0 = vmax.f32 %v511_v62, 0.0  ;;  %v1700_v1 = vpop.f32.mrb[8].mxu0 }
 0x104   : > { %v526_v2 = vadd.f32 %v1700_v1, %v2205_v37  ;;  %v520_v3 = vpop.f32.mrb[9].mxu0 }
 0x105   : > { %v521_v4 = vadd.f32 %v2205_v37, %v520_v3  ;;  %1727 = vmatprep.mubr.msk.f32.mxu1 %vm586_vm1, %v565_v0  ;;  %v1530_v0 = vld [vmem:[%s2507_s6] ss:$0 sm:$0xff] }
 0x106   : > { %v568_v5 = vmax.f32 %v526_v2, 0.0  ;;  %1728 = vmatmul.mubr.msk.f32.gmra.mrb[6].mxu1 %vm586_vm1, %v566_v63 }
 0x107   : > { %v567_v6 = vmax.f32 %v521_v4, 0.0  ;;  %v1703_v7 = vpop.f32.mrb[10].mxu0 }
 0x108   : > { %v536_v8 = vadd.f32 %v1703_v7, %v2205_v37  ;;  %v530_v9 = vpop.f32.mrb[11].mxu0 }
 0x109   : > { %v531_v10 = vadd.f32 %v2205_v37, %v530_v9  ;;  %1730 = vmatprep.mubr.msk.f32.mxu1 %vm586_vm1, %v567_v6 }
 0x10a   : > { %v570_v11 = vmax.f32 %v536_v8, 0.0  ;;  %1731 = vmatmul.mubr.msk.f32.gmra.mrb[8].mxu1 %vm586_vm1, %v568_v5 }
 0x10b   : > { %v569_v12 = vmax.f32 %v531_v10, 0.0  ;;  %v1706_v13 = vpop.f32.mrb[12].mxu0 }
 0x10c   : > { %v546_v14 = vadd.f32 %v1706_v13, %v2205_v37  ;;  %v540_v15 = vpop.f32.mrb[13].mxu0 }
 0x10d   : > { %v541_v16 = vadd.f32 %v2205_v37, %v540_v15  ;;  %1733 = vmatprep.mubr.msk.f32.mxu1 %vm586_vm1, %v569_v12 }
 0x10e   : > { %v572_v17 = vmax.f32 %v546_v14, 0.0  ;;  %1734 = vmatmul.mubr.msk.f32.gmra.mrb[10].mxu1 %vm586_vm1, %v570_v11 }
 0x10f   : > { %v571_v18 = vmax.f32 %v541_v16, 0.0  ;;  %v1709_v19 = vpop.f32.mrb[14].mxu0 }
 0x110   : > { %v556_v20 = vadd.f32 %v1709_v19, %v2205_v37  ;;  %v550_v21 = vpop.f32.mrb[15].mxu0 }
 0x111   : > { %v551_v22 = vadd.f32 %v2205_v37, %v550_v21  ;;  %1736 = vmatprep.mubr.msk.f32.mxu1 %vm586_vm1, %v571_v18 }
 0x112   : > { %v574_v23 = vmax.f32 %v556_v20, 0.0  ;;  %1737 = vmatmul.mubr.msk.f32.gmra.mrb[12].mxu1 %vm586_vm1, %v572_v17 }
 0x113   : > { %v573_v24 = vmax.f32 %v551_v22, 0.0 }
 0x115   : > { %1739 = vmatprep.mubr.msk.f32.mxu1 %vm586_vm1, %v573_v24 }
 0x116   : > { %1740 = vmatmul.mubr.msk.f32.gmra.mrb[14].mxu1 %vm586_vm1, %v574_v23 }
 0x1cd   : > { %v1720_v32 = vpop.f32.mrb[0].mxu1 }
 0x1ce   : > { %v701_v33 = vpop.f32.mrb[1].mxu1  ;;  %v2262_v35 = vadd.f32 %v1720_v32, %v1513_v31 }
 0x1cf   : > { %v2260_v34 = vadd.f32 %v1513_v31, %v701_v33 }
 0x1d1   : > { %v1723_v36 = vpop.f32.mrb[2].mxu1  ;;  %1750 = vmatprep.mubr.msk.f32.mxu1 %vm586_vm1, %v2260_v34 }
 0x1d2   : > { %v711_v37 = vpop.f32.mrb[3].mxu1  ;;  %1751 = vmatmul.mubr.msk.f32.vlgmr.msra.gmra.mrb[16].mxu1 %vm586_vm1, %v2262_v35  ;;  %v2270_v39 = vadd.f32 %v1723_v36, %v1513_v31 }
 0x1d3   : > { %v2268_v38 = vadd.f32 %v1513_v31, %v711_v37  ;;  %1848 = vmatpush3.bf16.msra.mxu1 %v1838_v28 }
 0x1d4   : > { %1847 = vmatprep.subr.bf16.mxu1 %v1842_v30 }
 0x1d5   : > { %v1726_v40 = vpop.f32.mrb[4].mxu1  ;;  %1753 = vmatprep.mubr.msk.f32.mxu1 %vm586_vm1, %v2268_v38 }
 0x1d6   : > { %v2274_v41 = vadd.f32 %v1726_v40, %v1513_v31  ;;  %v721_v42 = vpop.f32.mrb[5].mxu1  ;;  %1754 = vmatmul.mubr.msk.f32.gmra.mrb[18].mxu1 %vm586_vm1, %v2270_v39 }
 0x1d7   : > { %v2278_v43 = vadd.f32 %v1513_v31, %v721_v42  ;;  %1849 = vmatpush3.bf16.msra.mxu1 %v1842_v30 }
 0x1d9   : > { %v1729_v44 = vpop.f32.mrb[6].mxu1  ;;  %1756 = vmatprep.mubr.msk.f32.mxu1 %vm586_vm1, %v2278_v43 }
 0x1da   : > { %v2282_v45 = vadd.f32 %v1729_v44, %v1513_v31  ;;  %v731_v46 = vpop.f32.mrb[7].mxu1  ;;  %1757 = vmatmul.mubr.msk.f32.gmra.mrb[20].mxu1 %vm586_vm1, %v2274_v41 }
 0x1db   : > { %v2286_v47 = vadd.f32 %v1513_v31, %v731_v46 }
 0x1dd   : > { %v1732_v48 = vpop.f32.mrb[8].mxu1  ;;  %1759 = vmatprep.mubr.msk.f32.mxu1 %vm586_vm1, %v2286_v47 }
 0x1de   : > { %v2290_v49 = vadd.f32 %v1732_v48, %v1513_v31  ;;  %v741_v50 = vpop.f32.mrb[9].mxu1  ;;  %1760 = vmatmul.mubr.msk.f32.gmra.mrb[22].mxu1 %vm586_vm1, %v2282_v45 }
 0x1df   : > { %v2294_v51 = vadd.f32 %v1513_v31, %v741_v50 }
 0x1e1   : > { %v1735_v52 = vpop.f32.mrb[10].mxu1  ;;  %1762 = vmatprep.mubr.msk.f32.mxu1 %vm586_vm1, %v2294_v51 }
 0x1e2   : > { %v2298_v53 = vadd.f32 %v1735_v52, %v1513_v31  ;;  %v751_v54 = vpop.f32.mrb[11].mxu1  ;;  %1763 = vmatmul.mubr.msk.f32.gmra.mrb[24].mxu1 %vm586_vm1, %v2290_v49 }
 0x1e3   : > { %v2302_v55 = vadd.f32 %v1513_v31, %v751_v54 }
 0x1e5   : > { %v1738_v56 = vpop.f32.mrb[12].mxu1  ;;  %1765 = vmatprep.mubr.msk.f32.mxu1 %vm586_vm1, %v2302_v55 }
 0x1e6   : > { %v2306_v57 = vadd.f32 %v1738_v56, %v1513_v31  ;;  %v761_v58 = vpop.f32.mrb[13].mxu1  ;;  %1766 = vmatmul.mubr.msk.f32.gmra.mrb[26].mxu1 %vm586_vm1, %v2298_v53 }
 0x1e7   : > { %v2310_v59 = vadd.f32 %v1513_v31, %v761_v58 }
 0x1e9   : > { %v1741_v60 = vpop.f32.mrb[14].mxu1  ;;  %1768 = vmatprep.mubr.msk.f32.mxu1 %vm586_vm1, %v2310_v59 }
 0x1ea   : > { %v2314_v61 = vadd.f32 %v1741_v60, %v1513_v31  ;;  %v771_v62 = vpop.f32.mrb[15].mxu1  ;;  %1769 = vmatmul.mubr.msk.f32.gmra.mrb[28].mxu1 %vm586_vm1, %v2306_v57 }
 0x1eb   : > { %v2318_v63 = vadd.f32 %v1513_v31, %v771_v62 }
 0x1ed   : > { %1771 = vmatprep.mubr.msk.f32.mxu1 %vm586_vm1, %v2318_v63 }
 0x1ee   : > { %1772 = vmatmul.mubr.msk.f32.gmra.mrb[30].mxu1 %vm586_vm1, %v2314_v61 }
 0x2a5   : > { %v1752_v1 = vpop.f32.mrb[16].mxu1 }
 0x2a6   : > { %v911_v2 = vadd.f32 %v1752_v1, %v1530_v0  ;;  %v905_v3 = vpop.f32.mrb[17].mxu1 }
 0x2a7   : > { %v906_v4 = vadd.f32 %v1530_v0, %v905_v3 }
 0x2a8   : > { %v985_v7 = vmax.f32 %v911_v2, 0.0  ;;  %v2346_v2 = vld [vmem:[%s2509_s8] ss:$0 sm:$0xff] }
 0x2a9   : > { %v984_v5 = vmax.f32 %v906_v4, 0.0  ;;  %v1755_v6 = vpop.f32.mrb[18].mxu1 }
 0x2aa   : > { %v921_v8 = vadd.f32 %v1755_v6, %v1530_v0  ;;  %v915_v9 = vpop.f32.mrb[19].mxu1 }
 0x2ab   : > { %v916_v10 = vadd.f32 %v1530_v0, %v915_v9  ;;  %1782 = vmatprep.mubr.msk.f32.mxu0 %vm586_vm1, %v984_v5 }
 0x2ac   : > { %1783 = vmatmul.mubr.msk.f32.vlgmr.msra.gmra.mrb[16].mxu0 %vm586_vm1, %v985_v7  ;;  %v987_v13 = vmax.f32 %v921_v8, 0.0 }
 0x2ad   : > { %v986_v11 = vmax.f32 %v916_v10, 0.0  ;;  %v1758_v12 = vpop.f32.mrb[20].mxu1 }
 0x2ae   : > { %v931_v14 = vadd.f32 %v1758_v12, %v1530_v0  ;;  %v925_v15 = vpop.f32.mrb[21].mxu1 }
 0x2af   : > { %v926_v16 = vadd.f32 %v1530_v0, %v925_v15  ;;  %1785 = vmatprep.mubr.msk.f32.mxu0 %vm586_vm1, %v986_v11 }
 0x2b0   : > { %1786 = vmatmul.mubr.msk.f32.gmra.mrb[18].mxu0 %vm586_vm1, %v987_v13  ;;  %v989_v19 = vmax.f32 %v931_v14, 0.0 }
 0x2b1   : > { %v988_v17 = vmax.f32 %v926_v16, 0.0  ;;  %v1761_v18 = vpop.f32.mrb[22].mxu1 }
 0x2b2   : > { %v941_v20 = vadd.f32 %v1761_v18, %v1530_v0  ;;  %v935_v21 = vpop.f32.mrb[23].mxu1 }
 0x2b3   : > { %v936_v22 = vadd.f32 %v1530_v0, %v935_v21  ;;  %1788 = vmatprep.mubr.msk.f32.mxu0 %vm586_vm1, %v988_v17 }
 0x2b4   : > { %1789 = vmatmul.mubr.msk.f32.gmra.mrb[20].mxu0 %vm586_vm1, %v989_v19  ;;  %v991_v25 = vmax.f32 %v941_v20, 0.0 }
 0x2b5   : > { %v990_v23 = vmax.f32 %v936_v22, 0.0  ;;  %v1764_v24 = vpop.f32.mrb[24].mxu1 }
 0x2b6   : > { %v951_v26 = vadd.f32 %v1764_v24, %v1530_v0  ;;  %v945_v27 = vpop.f32.mrb[25].mxu1 }
 0x2b7   : > { %v946_v28 = vadd.f32 %v1530_v0, %v945_v27  ;;  %1791 = vmatprep.mubr.msk.f32.mxu0 %vm586_vm1, %v990_v23 }
 0x2b8   : > { %1792 = vmatmul.mubr.msk.f32.gmra.mrb[22].mxu0 %vm586_vm1, %v991_v25  ;;  %v993_v31 = vmax.f32 %v951_v26, 0.0 }
 0x2b9   : > { %v992_v29 = vmax.f32 %v946_v28, 0.0  ;;  %v1767_v30 = vpop.f32.mrb[26].mxu1 }
 0x2ba   : > { %v961_v32 = vadd.f32 %v1767_v30, %v1530_v0  ;;  %v955_v33 = vpop.f32.mrb[27].mxu1 }
 0x2bb   : > { %v956_v36 = vadd.f32 %v1530_v0, %v955_v33  ;;  %1794 = vmatprep.mubr.msk.f32.mxu0 %vm586_vm1, %v992_v29 }
 0x2bc   : > { %1795 = vmatmul.mubr.msk.f32.gmra.mrb[24].mxu0 %vm586_vm1, %v993_v31  ;;  %v995_v42 = vmax.f32 %v961_v32, 0.0 }
 0x2bd   : > { %v994_v37 = vmax.f32 %v956_v36, 0.0  ;;  %v1770_v40 = vpop.f32.mrb[28].mxu1 }
 0x2be   : > { %v971_v44 = vadd.f32 %v1770_v40, %v1530_v0  ;;  %v965_v46 = vpop.f32.mrb[29].mxu1 }
 0x2bf   : > { %v966_v48 = vadd.f32 %v1530_v0, %v965_v46  ;;  %1797 = vmatprep.mubr.msk.f32.mxu0 %vm586_vm1, %v994_v37 }
 0x2c0   : > { %1798 = vmatmul.mubr.msk.f32.gmra.mrb[26].mxu0 %vm586_vm1, %v995_v42  ;;  %v997_v54 = vmax.f32 %v971_v44, 0.0 }
 0x2c1   : > { %v996_v50 = vmax.f32 %v966_v48, 0.0  ;;  %v1773_v52 = vpop.f32.mrb[30].mxu1 }
 0x2c2   : > { %v981_v56 = vadd.f32 %v1773_v52, %v1530_v0  ;;  %v975_v58 = vpop.f32.mrb[31].mxu1 }
 0x2c3   : > { %v976_v60 = vadd.f32 %v1530_v0, %v975_v58  ;;  %1800 = vmatprep.mubr.msk.f32.mxu0 %vm586_vm1, %v996_v50 }
 0x2c4   : > { %1801 = vmatmul.mubr.msk.f32.gmra.mrb[28].mxu0 %vm586_vm1, %v997_v54  ;;  %v999_v1 = vmax.f32 %v981_v56, 0.0 }
 0x2c5   : > { %v998_v62 = vmax.f32 %v976_v60, 0.0 }
 0x2c7   : > { %1803 = vmatprep.mubr.msk.f32.mxu1 %vm586_vm1, %v998_v62 }
 0x2c8   : > { %1804 = vmatmul.mubr.msk.f32.vlgmr.msra.gmra.mrb[32].mxu1 %vm586_vm1, %v999_v1 }
 0x37f   : > { %v1784_v3 = vpop.f32.mrb[16].mxu0 }
 0x380   : > { %v1131_v4 = vadd.f32 %v1784_v3, %v2346_v2  ;;  %v1125_v5 = vpop.f32.mrb[17].mxu0 }
 0x381   : > { %v1126_v0 = vadd.f32 %v2346_v2, %v1125_v5 }
 0x382   : > { %v1565_v6 = vmul.f32 -1.442695, %v1131_v4 }
 0x383   : > { %v1564_v7 = vmul.f32 -1.442695, %v1126_v0  ;;  %v1787_v8 = vpop.f32.mrb[18].mxu0 }
 0x384   : > { %1892 = vpow2.f32 %v1565_v6  ;;  %v1141_v9 = vadd.f32 %v1787_v8, %v2346_v2  ;;  %v1135_v10 = vpop.f32.mrb[19].mxu0 }
 0x385   : > { %1894 = vpow2.f32 %v1564_v7  ;;  %v1136_v11 = vadd.f32 %v2346_v2, %v1135_v10 }
 0x386   : > { %v1567_v12 = vmul.f32 -1.442695, %v1141_v9 }
 0x387   : > { %v1566_v13 = vmul.f32 -1.442695, %v1136_v11  ;;  %v1790_v14 = vpop.f32.mrb[20].mxu0 }
 0x388   : > { %1896 = vpow2.f32 %v1567_v12  ;;  %v1151_v15 = vadd.f32 %v1790_v14, %v2346_v2  ;;  %v1145_v16 = vpop.f32.mrb[21].mxu0 }
 0x389   : > { %1898 = vpow2.f32 %v1566_v13  ;;  %v1146_v17 = vadd.f32 %v2346_v2, %v1145_v16 }
 0x38a   : > { %v1569_v18 = vmul.f32 -1.442695, %v1151_v15 }
 0x38b   : > { %v1568_v19 = vmul.f32 -1.442695, %v1146_v17  ;;  %v1793_v20 = vpop.f32.mrb[22].mxu0 }
 0x38c   : > { %1900 = vpow2.f32 %v1569_v18  ;;  %v1161_v21 = vadd.f32 %v1793_v20, %v2346_v2  ;;  %v1155_v22 = vpop.f32.mrb[23].mxu0 }
 0x38d   : > { %1902 = vpow2.f32 %v1568_v19  ;;  %v1156_v23 = vadd.f32 %v2346_v2, %v1155_v22 }
 0x38e   : > { %v1893_v24 = vpop.eup %1892  ;;  %v1571_v25 = vmul.f32 -1.442695, %v1161_v21 }
 0x38f   : > { %v1895_v26 = vpop.eup %1894  ;;  %v1253_v27 = vadd.f32 1.0, %v1893_v24  ;;  %v1570_v28 = vmul.f32 -1.442695, %v1156_v23  ;;  %v1796_v29 = vpop.f32.mrb[24].mxu0 }
 0x390   : > { %v1252_v30 = vadd.f32 1.0, %v1895_v26  ;;  %1904 = vpow2.f32 %v1571_v25  ;;  %v1171_v31 = vadd.f32 %v1796_v29, %v2346_v2  ;;  %v1165_v32 = vpop.f32.mrb[25].mxu0 }
 0x391   : > { %1906 = vrcp.f32 %v1253_v27  ;;  %v1166_v33 = vadd.f32 %v2346_v2, %v1165_v32 }
 0x392   : > { %v1897_v36 = vpop.eup %1896  ;;  %1908 = vrcp.f32 %v1252_v30  ;;  %v1573_v37 = vmul.f32 -1.442695, %v1171_v31 }
 0x393   : > { %v1899_v40 = vpop.eup %1898  ;;  %v1255_v42 = vadd.f32 1.0, %v1897_v36  ;;  %1910 = vpow2.f32 %v1570_v28  ;;  %v1572_v44 = vmul.f32 -1.442695, %v1166_v33  ;;  %v1799_v46 = vpop.f32.mrb[26].mxu0 }
 0x394   : > { %1912 = vpow2.f32 %v1573_v37  ;;  %v1181_v48 = vadd.f32 %v1799_v46, %v2346_v2  ;;  %v1175_v50 = vpop.f32.mrb[27].mxu0  ;;  %v1254_v52 = vadd.f32 1.0, %v1899_v40 }
 0x395   : > { %1914 = vrcp.f32 %v1255_v42  ;;  %v1176_v54 = vadd.f32 %v2346_v2, %v1175_v50 }
 0x396   : > { %v1901_v56 = vpop.eup %1900  ;;  %v1575_v58 = vmul.f32 -1.442695, %v1181_v48  ;;  %1916 = vpow2.f32 %v1572_v44 }
 0x397   : > { %v1903_v60 = vpop.eup %1902  ;;  %v1574_v62 = vmul.f32 -1.442695, %v1176_v54  ;;  %v1802_v1 = vpop.f32.mrb[28].mxu0  ;;  %v1257_v0 = vadd.f32 1.0, %v1901_v56 }
 0x398   : > { %v1256_v3 = vadd.f32 1.0, %v1903_v60  ;;  %1918 = vpow2.f32 %v1575_v58  ;;  %v1191_v4 = vadd.f32 %v1802_v1, %v2346_v2  ;;  %v1185_v5 = vpop.f32.mrb[29].mxu0 }
 0x399   : > { %1920 = vrcp.f32 %v1254_v52  ;;  %v1186_v6 = vadd.f32 %v2346_v2, %v1185_v5 }
 0x39a   : > { %v1905_v7 = vpop.eup %1904  ;;  %1922 = vrcp.f32 %v1256_v3  ;;  %v1577_v8 = vmul.f32 -1.442695, %v1191_v4 }
 0x39b   : > { %v1907_v9 = vpop.eup %1906  ;;  %1924 = vpow2.f32 %v1574_v62  ;;  %v1576_v10 = vmul.f32 -1.442695, %v1186_v6  ;;  %v1805_v11 = vpop.f32.mrb[32].mxu1  ;;  %v1259_v16 = vadd.f32 1.0, %v1905_v7 }
 0x39c   : > { %v1909_v12 = vpop.eup %1908  ;;  %1926 = vpow2.f32 %v1577_v8  ;;  %v1201_v13 = vadd.f32 %v1805_v11, %v2346_v2  ;;  %v1195_v14 = vpop.f32.mrb[33].mxu1  ;;  %1318 = vrot.lane.b32.xlu0 %v1907_v9, %s2020_s26 }
 0x39d   : > { %v1911_v15 = vpop.eup %1910  ;;  %1928 = vrcp.f32 %v1257_v0  ;;  %v1196_v17 = vadd.f32 %v2346_v2, %v1195_v14 }
 0x39e   : > { %v1913_v18 = vpop.eup %1912  ;;  %v1258_v19 = vadd.f32 1.0, %v1911_v15  ;;  %1930 = vpow2.f32 %v1576_v10  ;;  %v1579_v20 = vmul.f32 -1.442695, %v1201_v13 }
 0x39f   : > { %v1915_v21 = vpop.eup %1914  ;;  %v1578_v22 = vmul.f32 -1.442695, %v1196_v17  ;;  %v1261_v24 = vadd.f32 1.0, %v1913_v18 }
 0x3a0   : > { %1932 = vrcp.f32 %v1258_v19  ;;  %1322 = vrot.lane.b32.xlu1 %v1915_v21, %s2020_s26  ;;  %1316 = vrot.lane.b32.xlu0 %v1909_v12, %s2020_s26  ;;  %v1917_v23 = vpop.eup %1916 }
 0x3a1   : > { %1934 = vrcp.f32 %v1259_v16  ;;  %v1260_v26 = vadd.f32 1.0, %v1917_v23 }
 0x3a2   : > { %v1919_v25 = vpop.eup %1918  ;;  %1936 = vpow2.f32 %v1579_v20 }
 0x3a3   : > { %v1921_v27 = vpop.eup %1920  ;;  %1938 = vpow2.f32 %v1578_v22  ;;  %v1263_v29 = vadd.f32 1.0, %v1919_v25 }
 0x3a4   : > { %v1923_v2 = vpop.eup %1922  ;;  %1940 = vrcp.f32 %v1260_v26  ;;  %1320 = vrot.lane.b32.xlu1 %v1921_v27, %s2020_s26 }
 0x3a5   : > { %v1925_v28 = vpop.eup %1924  ;;  %1942 = vrcp.f32 %v1261_v24  ;;  %1324 = vrot.lane.b32.xlu0 %v1923_v2, %s2020_s26 }
 0x3a6   : > { %v1927_v30 = vpop.eup %1926  ;;  %v1262_v31 = vadd.f32 1.0, %v1925_v28 }
 0x3a7   : > { %v1929_v32 = vpop.eup %1928  ;;  %v1265_v36 = vadd.f32 1.0, %v1927_v30 }
 0x3a8   : > { %v1931_v33 = vpop.eup %1930  ;;  %1944 = vrcp.f32 %v1262_v31  ;;  %1326 = vrot.lane.b32.xlu1 %v1929_v32, %s2020_s26 }
 0x3a9   : > { %1946 = vrcp.f32 %v1263_v29  ;;  %v1264_v37 = vadd.f32 1.0, %v1931_v33 }
 0x3aa   : > { %v1933_v40 = vpop.eup %1932 }
 0x3ab   : > { %v1935_v42 = vpop.eup %1934  ;;  %1948 = vrcp.f32 %v1264_v37  ;;  %1328 = vrot.lane.b32.xlu0 %v1933_v40, %s2020_s26 }
 0x3ac   : > { %v1937_v44 = vpop.eup %1936  ;;  %1330 = vrot.lane.b32.xlu1 %v1935_v42, %s2020_s26  ;;  %1950 = vrcp.f32 %v1265_v36 }
 0x3ad   : > { %v1939_v46 = vpop.eup %1938  ;;  %v1267_v48 = vadd.f32 1.0, %v1937_v44 }
 0x3ae   : > { %v1941_v50 = vpop.eup %1940  ;;  %v1266_v52 = vadd.f32 1.0, %v1939_v46 }
 0x3af   : > { %v1943_v54 = vpop.eup %1942  ;;  %1332 = vrot.lane.b32.xlu0 %v1941_v50, %s2020_s26 }
 0x3b0   : > { %1952 = vrcp.f32 %v1266_v52  ;;  %1334 = vrot.lane.b32.xlu1 %v1943_v54, %s2020_s26 }
 0x3b1   : > { %1954 = vrcp.f32 %v1267_v48 }
 0x3b2   : > { %v1945_v56 = vpop.eup %1944 }
 0x3b3   : > { %v1947_v58 = vpop.eup %1946  ;;  %1336 = vrot.lane.b32.xlu0 %v1945_v56, %s2020_s26 }
 0x3b4   : > { %1338 = vrot.lane.b32.xlu1 %v1947_v58, %s2020_s26 }
 0x3b5   : > { %v1949_v60 = vpop.eup %1948 }
 0x3b6   : > { %v1951_v62 = vpop.eup %1950 }
 0x3b7   : > { %1340 = vrot.lane.b32.xlu0 %v1949_v60, %s2020_s26 }
 0x3b8   : > { %1342 = vrot.lane.b32.xlu1 %v1951_v62, %s2020_s26 }
 0x3ba   : > { %v1953_v1 = vpop.eup %1952 }
 0x3bb   : > { %v1955_v3 = vpop.eup %1954  ;;  %1344 = vrot.lane.b32.xlu0 %v1953_v1, %s2020_s26 }
 0x3bc   : > { %1346 = vrot.lane.b32.xlu1 %v1955_v3, %s2020_s26  ;;  %s1962_s26 = scalar_lea.vmem %s1961_s25, 4096 }
 0x3bd   : > { %p1964_p1 = scmp.lt.s32.totalorder %s1962_s26, %s1956_s23 }
 0x3bf   : > { %p1965_p2 = por %p1964_p1, %p1963_p0 }
 0x3c1   : > { %p1966_p3 = pnand %p1965_p2, %p1959_p13 }
 0x40e   : > { %v1319_v4 = vpop.permute.xlu0 %1318 }
 0x40f   : > { %v1365_v5 = vsel %vm586_vm1, %v2262_v35, %v1319_v4 }
 0x410   : > { %v1382_v0 = vsel %vm1380_vm2, %v1365_v5, 0.0 }
 0x411   : > { %1398 = vst [vmem:[%s2386_s14 + $0x8] sm:$0xff] %v1382_v0 }
 0x412   : > { %v1323_v6 = vpop.permute.xlu1 %1322  ;;  %v1317_v7 = vpop.permute.xlu0 %1316 }
 0x413   : > { %v1367_v8 = vsel %vm586_vm1, %v2270_v39, %v1323_v6  ;;  %v1364_v9 = vsel %vm586_vm1, %v2260_v34, %v1317_v7 }
 0x414   : > { %v1384_v35 = vsel %vm1380_vm2, %v1367_v8, 0.0  ;;  %v1381_v10 = vsel %vm1380_vm2, %v1364_v9, 0.0 }
 0x415   : > { %1400 = vst [vmem:[%s2386_s14 + $0x18] sm:$0xff] %v1384_v35  ;;  %1397 = vst [vmem:[%s2386_s14] sm:$0xff] %v1381_v10 }
 0x416   : > { %v1321_v11 = vpop.permute.xlu1 %1320 }
 0x417   : > { %v1366_v12 = vsel %vm586_vm1, %v2268_v38, %v1321_v11  ;;  %v1325_v13 = vpop.permute.xlu0 %1324 }
 0x418   : > { %v1383_v14 = vsel %vm1380_vm2, %v1366_v12, 0.0  ;;  %v1368_v39 = vsel %vm586_vm1, %v2278_v43, %v1325_v13 }
 0x419   : > { %1399 = vst [vmem:[%s2386_s14 + $0x10] sm:$0xff] %v1383_v14  ;;  %v1385_v34 = vsel %vm1380_vm2, %v1368_v39, 0.0 }
 0x41a   : > { %1401 = vst [vmem:[%s2386_s14 + $0x20] sm:$0xff] %v1385_v34  ;;  %v1327_v15 = vpop.permute.xlu1 %1326 }
 0x41b   : > { %v1369_v16 = vsel %vm586_vm1, %v2274_v41, %v1327_v15 }
 0x41c   : > { %v1386_v17 = vsel %vm1380_vm2, %v1369_v16, 0.0 }
 0x41d   : > { %1402 = vst [vmem:[%s2386_s14 + $0x28] sm:$0xff] %v1386_v17  ;;  %v1329_v38 = vpop.permute.xlu0 %1328 }
 0x41e   : > { %v1370_v18 = vsel %vm586_vm1, %v2286_v47, %v1329_v38  ;;  %v1331_v19 = vpop.permute.xlu1 %1330 }
 0x41f   : > { %v1387_v43 = vsel %vm1380_vm2, %v1370_v18, 0.0  ;;  %v1371_v20 = vsel %vm586_vm1, %v2282_v45, %v1331_v19 }
 0x420   : > { %1403 = vst [vmem:[%s2386_s14 + $0x30] sm:$0xff] %v1387_v43  ;;  %v1388_v21 = vsel %vm1380_vm2, %v1371_v20, 0.0 }
 0x421   : > { %1404 = vst [vmem:[%s2386_s14 + $0x38] sm:$0xff] %v1388_v21  ;;  %v1333_v41 = vpop.permute.xlu0 %1332 }
 0x422   : > { %v1372_v22 = vsel %vm586_vm1, %v2294_v51, %v1333_v41  ;;  %v1335_v23 = vpop.permute.xlu1 %1334 }
 0x423   : > { %v1389_v24 = vsel %vm1380_vm2, %v1372_v22, 0.0  ;;  %v1373_v47 = vsel %vm586_vm1, %v2290_v49, %v1335_v23 }
 0x424   : > { %1405 = vst [vmem:[%s2386_s14 + $0x40] sm:$0xff] %v1389_v24  ;;  %v1390_v45 = vsel %vm1380_vm2, %v1373_v47, 0.0 }
 0x425   : > { %1406 = vst [vmem:[%s2386_s14 + $0x48] sm:$0xff] %v1390_v45  ;;  %v1337_v25 = vpop.permute.xlu0 %1336 }
 0x426   : > { %v1374_v26 = vsel %vm586_vm1, %v2302_v55, %v1337_v25  ;;  %v1339_v27 = vpop.permute.xlu1 %1338 }
 0x427   : > { %v1391_v51 = vsel %vm1380_vm2, %v1374_v26, 0.0  ;;  %v1375_v2 = vsel %vm586_vm1, %v2298_v53, %v1339_v27 }
 0x428   : > { %1407 = vst [vmem:[%s2386_s14 + $0x50] sm:$0xff] %v1391_v51  ;;  %v1392_v49 = vsel %vm1380_vm2, %v1375_v2, 0.0 }
 0x429   : > { %1408 = vst [vmem:[%s2386_s14 + $0x58] sm:$0xff] %v1392_v49  ;;  %v1341_v28 = vpop.permute.xlu0 %1340 }
 0x42a   : > { %v1376_v29 = vsel %vm586_vm1, %v2310_v59, %v1341_v28  ;;  %v1343_v30 = vpop.permute.xlu1 %1342 }
 0x42b   : > { %v1393_v31 = vsel %vm1380_vm2, %v1376_v29, 0.0  ;;  %v1377_v55 = vsel %vm586_vm1, %v2306_v57, %v1343_v30 }
 0x42c   : > { %1409 = vst [vmem:[%s2386_s14 + $0x60] sm:$0xff] %v1393_v31  ;;  %v1394_v53 = vsel %vm1380_vm2, %v1377_v55, 0.0 }
 0x42d   : > { %1410 = vst [vmem:[%s2386_s14 + $0x68] sm:$0xff] %v1394_v53  ;;  %v1345_v32 = vpop.permute.xlu0 %1344 }
 0x42e   : > { %v1378_v59 = vsel %vm586_vm1, %v2318_v63, %v1345_v32  ;;  %v1347_v33 = vpop.permute.xlu1 %1346 }
 0x42f   : > { %v1395_v57 = vsel %vm1380_vm2, %v1378_v59, 0.0  ;;  %v1379_v36 = vsel %vm586_vm1, %v2314_v61, %v1347_v33 }
 0x430   : > { %1411 = vst [vmem:[%s2386_s14 + $0x70] sm:$0xff] %v1395_v57  ;;  %v1396_v37 = vsel %vm1380_vm2, %v1379_v36, 0.0 }
 0x431   : > { %1412 = vst [vmem:[%s2386_s14 + $0x78] sm:$0xff] %v1396_v37 }
 0x432   : > { %1969 = shalt.err (!%p1966_p3)
}
 0x433   : > { %s1970_s28 = scalar_lea.hbm %s2448_s27, 2048  ;;  %s1974_s16 = scalar_lea.hbm %s2510_s9, 4096 }
 0x434   : > { %p1971_p4 = scmp.ne.s32.totalorder %s2448_s27, %s1970_s28  ;;  %p1975_p9 = scmp.lt.u32.totalorder %s2448_s27, %s2510_s9 }
 0x435   : > { %p1976_p10 = scmp.lt.u32.totalorder %s1974_s16, %s1970_s28  ;;  %p1978_p12 = scmp.lt.u32.totalorder %s1970_s28, %s2448_s27 }
 0x436   : > { %p1972_p7 = pnand %p1971_p4, %p2112_p5 }
 0x437   : > { %p1977_p11 = por %p1976_p10, %p1975_p9 }
 0x438   : > { %p1973_p8 = pneg %p1972_p7 }
 0x439   : > { %p1979_p13 = por %p1978_p12, %p1977_p11 }
 0x43b   : > { %p1980_p0 = pnand %p1979_p13, %p1973_p8 }
 0x43d   : > { %1983 = shalt.err (!%p1980_p0)
}
 0x43e   : > { %s2022_s23 = smov 128   ;;  %s2023_s24 = smov 8  }
 0x43f   : > { %1850 = dma.vmem_to_hbm [thread:$0]  (%p2112_p5), %s2450_s17, 2048, %s2448_s27, %s2460_s13, %s2022_s23, %s2022_s23, %s2023_s24  }
 0x440 PF: > { %p1856_p1 = scmp.ge.s32.totalorder %s2018_s12, 2  ;;  %s1442_s25 = sand.u32 1, %s2006_s30  }
 0x441   : > { %s1443_s26 = scalar_lea.sflag [#allocation3], %s1442_s25 }
 0x442   : > { %p1853_p2 = pnand %p1856_p1, %p2116_p6 }
 0x444   : > { %2001 = dma.done.wait (!%p1853_p2), %s1443_s26, 2048  }
 0x445   : > { %2003 = vsyncadd (!%p1853_p2), %s1443_s26, 4294965248  ;;  %p19_p3 = scmp.ge.s32.totalorder %s2099_s15, 4   ;;  %s2513_s30 = smov %s2010_s10 }
 0x446   : > { %s2514_s10 = smov %s2014_s11  ;;  %s2515_s11 = smov %s2110_s18 }
 0x447   : > { %s2516_s12 = smov %s2099_s15  ;;  %21 = sbr.rel (!%p19_p3) target bundleno = 3 (0x3), region = 91 }
 0x44e   :  { %1448 = vsyncpa [#allocation3], 1 }
 0x44f   :  { %1450 = vsyncpa [#allocation3 + $0x1], 1 }

</bundles_post_ra>
